<compile_context>
chip_gen: v5e
topology: v5e:2x2
jax: 0.10.0
libtpu: 0.0.40
codegen_flags: <defaults>
</compile_context>

<pallas_src>
import functools

import numpy as np
import jax
import jax.numpy as jnp
from jax.experimental import pallas as pl
from jax.experimental.pallas import tpu as pltpu


# ----------------------------------------------------------------------------
# helpers
# ----------------------------------------------------------------------------
def _round_up(x, m):
    return (x + m - 1) // m * m


def _adaptive_pool_matrix(in_size, out_size):
    """(in_size, out_size) averaging matrix matching torch AdaptiveAvgPool."""
    m = np.zeros((in_size, out_size), np.float32)
    for o in range(out_size):
        s = (o * in_size) // out_size
        e = ((o + 1) * in_size + out_size - 1) // out_size
        m[s:e, o] = 1.0 / (e - s)
    return m


@functools.lru_cache(maxsize=16)
def _pool9_matrix_padded(H, W, kp):
    """(kp,128) lane-padded AdaptiveAvgPool2d(9) matrix; cached per (H,W,kp)."""
    ph = _adaptive_pool_matrix(H, 9)                      # (H, 9)
    pw = _adaptive_pool_matrix(W, 9)                      # (W, 9)
    p2 = np.einsum('ho,wp->hwop', ph, pw).reshape(H * W, 81)
    out = np.zeros((kp, 128), np.float32)
    out[:H * W, :81] = p2
    return out


# ----------------------------------------------------------------------------
# K1: AdaptiveAvgPool2d(9) as a tiled, pipelined GEMM
# ----------------------------------------------------------------------------
def _pool_gemm_kernel(x_ref, p_ref, o_ref, acc_ref, *, tk, hw, p_resident):
    k = pl.program_id(1)

    @pl.when(k == 0)
    def _():
        acc_ref[...] = jnp.zeros_like(acc_ref)

    x_tile = x_ref[...]
    if hw % tk != 0:
        # last K tile is ragged: zero the garbage columns before the dot
        col = k * tk + jax.lax.broadcasted_iota(jnp.int32, x_tile.shape, 1)
        x_tile = jnp.where(col < hw, x_tile, 0.0)

    if p_resident:
        start = k * tk
        if tk % 128 == 0:
            start = pl.multiple_of(start, 128)
        p_tile = p_ref[pl.ds(start, tk), :]               # slice resident matrix
    else:
        p_tile = p_ref[...]                               # streamed per K tile

    acc_ref[...] += jnp.dot(x_tile, p_tile, preferred_element_type=jnp.float32)

    @pl.when(k == pl.num_programs(1) - 1)
    def _():
        o_ref[...] = acc_ref[...]


def adaptive_pool9_pallas(x_nchw):
    """(B,C,H,W) -> (B,C,81) via a tiled GEMM over the flattened spatial dim."""
    B, C, H, W = x_nchw.shape
    HW = H * W
    M = B * C

    # large, non-degenerate tiles (full-extent when small; ragged tails OK)
    tm = M if M <= 512 else 512
    tk = HW if HW <= 2048 else 2048
    grid_m = pl.cdiv(M, tm)
    grid_k = pl.cdiv(HW, tk)
    kp = grid_k * tk

    p_bytes = kp * 128 * 4
    p_resident = p_bytes <= (8 << 20)      # keep whole pool matrix in VMEM

    pool = jnp.asarray(_pool9_matrix_padded(H, W, kp))
    x2 = x_nchw.reshape(M, HW)             # free reshape of NCHW layout, no pad

    if p_resident:
        p_spec = pl.BlockSpec((kp, 128), lambda i, k: (0, 0))   # DMA'd once
    else:
        p_spec = pl.BlockSpec((tk, 128), lambda i, k: (k, 0))

    x_blk = tm * tk * 4
    out_blk = tm * 128 * 4
    need = (2 * x_blk + 2 * (p_bytes if p_resident else tk * 128 * 4)
            + 2 * out_blk + out_blk)
    vmem_limit = max(32 << 20, min(int(need * 1.3) + (2 << 20), 48 << 20))

    out = pl.pallas_call(
        functools.partial(_pool_gemm_kernel, tk=tk, hw=HW, p_resident=p_resident),
        out_shape=jax.ShapeDtypeStruct((M, 128), jnp.float32),
        grid=(grid_m, grid_k),
        in_specs=[pl.BlockSpec((tm, tk), lambda i, k: (i, k)), p_spec],
        out_specs=pl.BlockSpec((tm, 128), lambda i, k: (i, 0)),
        scratch_shapes=[pltpu.VMEM((tm, 128), jnp.float32)],
        compiler_params=pltpu.CompilerParams(
            dimension_semantics=("parallel", "arbitrary"),
            vmem_limit_bytes=vmem_limit),
    )(x2, pool)
    return out[:, :81].reshape(B, C, 81)   # tiny slice (81 cols per channel)


# ----------------------------------------------------------------------------
# K2: fused conv3x3 + bias + ReLU + global mean + FC1 + ReLU + FC2 + ReLU
#     (single grid step, batched over B)
# ----------------------------------------------------------------------------
def _head_kernel(p_ref, wc_ref, bc_ref, r_ref, w1_ref, w2_ref, o_ref):
    conv = jnp.dot(p_ref[...], wc_ref[...], preferred_element_type=jnp.float32)
    conv = jnp.maximum(conv + bc_ref[...], 0.0)                  # (B*81p, Cp)
    pooled = jnp.dot(r_ref[...], conv,
                     preferred_element_type=jnp.float32)         # (Bp, Cp) means
    h = jnp.maximum(jnp.dot(pooled, w1_ref[...],
                            preferred_element_type=jnp.float32), 0.0)
    y = jnp.maximum(jnp.dot(h, w2_ref[...],
                            preferred_element_type=jnp.float32), 0.0)
    o_ref[...] = y


def _im2col_3x3_pad1(y_img):
    """(B,9,9,C) -> (B,81,9*C) patches (tiny tensor; plain-JAX glue)."""
    B, Hh, Ww, C = y_img.shape
    yp = jnp.pad(y_img, ((0, 0), (1, 1), (1, 1), (0, 0)))
    cols = [yp[:, i:i + Hh, j:j + Ww, :] for i in range(3) for j in range(3)]
    p = jnp.stack(cols, axis=3)                   # (B, 9, 9, 9, C)
    return p.reshape(B, Hh * Ww, 9 * C)


def head_pallas(patches, wc2p, bcp, r, w1tp, w2tp):
    Bp = r.shape[0]
    Cp = wc2p.shape[1]
    return pl.pallas_call(
        _head_kernel,
        out_shape=jax.ShapeDtypeStruct((Bp, Cp), jnp.float32),
    )(patches, wc2p, bcp, r, w1tp, w2tp)


# ----------------------------------------------------------------------------
# K3: broadcast the (B,C) gate over the flattened spatial axis
# ----------------------------------------------------------------------------
def _broadcast_kernel(y_ref, o_ref):
    o_ref[...] = jnp.broadcast_to(y_ref[...], o_ref.shape)


def broadcast_spatial_pallas(y_bc, H, W):
    """(B,C) -> (B,C,H,W): lane-dense broadcast, exact out_shape (no slicing)."""
    B, C = y_bc.shape
    HW = H * W
    # ~4 MiB lane-dense output tiles (amortizes per-step overhead on v7x too)
    thw_cap = max(128, (4 * 1024 * 1024 // (4 * C)) // 128 * 128)
    thw = HW if HW <= thw_cap else thw_cap
    grid_s = pl.cdiv(HW, thw)

    need = 2 * (C * thw * 4) + 2 * (C * 4)
    vmem_limit = max(32 << 20, min(int(need * 1.3) + (1 << 20), 48 << 20))

    y3 = y_bc[:, :, None]                         # (B, C, 1) -- tiny relayout
    out = pl.pallas_call(
        _broadcast_kernel,
        out_shape=jax.ShapeDtypeStruct((B, C, HW), jnp.float32),
        grid=(B, grid_s),
        in_specs=[pl.BlockSpec((1, C, 1), lambda b, t: (b, 0, 0))],
        out_specs=pl.BlockSpec((1, C, thw), lambda b, t: (b, 0, t)),
        compiler_params=pltpu.CompilerParams(
            dimension_semantics=("parallel", "parallel"),
            vmem_limit_bytes=vmem_limit),
    )(y3)
    return out.reshape(B, C, H, W)                # free reshape


# ----------------------------------------------------------------------------
# TextureLayer: parameters + forward
# ----------------------------------------------------------------------------
def build_texture_layer_params(key, channel, reduction=16):
    hidden = channel // reduction
    kc, kb, k1, k2 = jax.random.split(key, 4)
    return dict(
        conv_w=jax.random.normal(kc, (channel, channel, 3, 3), jnp.float32) * 0.05,
        conv_b=jax.random.normal(kb, (channel,), jnp.float32) * 0.05,
        fc1_w=jax.random.normal(k1, (hidden, channel), jnp.float32) * 0.05,  # torch (out,in)
        fc2_w=jax.random.normal(k2, (channel, hidden), jnp.float32) * 0.05,
    )


def texture_layer_forward(x_nchw, params):
    B, C, H, W = x_nchw.shape
    hidden = params['fc1_w'].shape[0]
    Cp = _round_up(C, 128)
    Rp = _round_up(hidden, 128)
    K2p = _round_up(9 * C, 128)
    B81p = _round_up(B * 81, 8)
    Bp = _round_up(B, 8)

    # K1: AdaptiveAvgPool2d(9) as a tiled, pipelined GEMM over the full input
    y81 = adaptive_pool9_pallas(x_nchw)                       # (B, C, 81)
    y9 = jnp.transpose(y81, (0, 2, 1)).reshape(B, 9, 9, C)    # tiny glue

    # padded weights (tiny, prepared once per call; constants under jit)
    wc2 = jnp.transpose(params['conv_w'], (2, 3, 1, 0)).reshape(9 * C, C)
    wc2p = jnp.pad(wc2, ((0, K2p - 9 * C), (0, Cp - C)))
    bcp = jnp.pad(params['conv_b'][None, :], ((0, 0), (0, Cp - C)))
    w1tp = jnp.pad(params['fc1_w'].T, ((0, Cp - C), (0, Rp - hidden)))
    w2tp = jnp.pad(params['fc2_w'].T, ((0, Rp - hidden), (0, Cp - C)))

    # per-batch mean over the 81 conv outputs as a tiny reduction matrix
    r = np.zeros((Bp, B81p), np.float32)
    r[:B, :B * 81] = np.kron(np.eye(B, dtype=np.float32),
                             np.full((1, 81), 1.0 / 81.0, np.float32))
    r = jnp.asarray(r)

    patches = _im2col_3x3_pad1(y9).reshape(B * 81, 9 * C)     # tiny
    patches = jnp.pad(patches, ((0, B81p - B * 81), (0, K2p - 9 * C)))

    # K2: fused conv3x3 + ReLU + global mean + FC stack, batched over B
    y = head_pallas(patches, wc2p, bcp, r, w1tp, w2tp)[:B, :C]   # (B, C)

    # K3: broadcast the gate over the spatial dims (y.expand_as(x))
    return broadcast_spatial_pallas(y, H, W)                  # (B, C, H, W)


def texture_layer_reference(x, params):
    """Pure-JAX reference of the PyTorch forward, for correctness checking."""
    B, C, H, W = x.shape
    ph = jnp.asarray(_adaptive_pool_matrix(H, 9))
    pw = jnp.asarray(_adaptive_pool_matrix(W, 9))
    y = jnp.einsum('bchw,ho,wp->bcop', x, ph, pw)             # AdaptiveAvgPool2d(9)
    y = jax.lax.conv_general_dilated(
        y, params['conv_w'], window_strides=(1, 1), padding=((1, 1), (1, 1)),
        dimension_numbers=('NCHW', 'OIHW', 'NCHW'))
    y = jax.nn.relu(y + params['conv_b'][None, :, None, None])
    y = jnp.mean(y, axis=(2, 3))                              # AdaptiveAvgPool2d(1)
    y = jax.nn.relu(y @ params['fc1_w'].T)
    y = jax.nn.relu(y @ params['fc2_w'].T)
    return jnp.broadcast_to(y[:, :, None, None], x.shape)


# ----------------------------------------------------------------------------
if __name__ == "__main__":
    B, C, H, W = 2, 32, 16, 16       # channel=32 so channel//reduction(16)=2
    reduction = 16

    key = jax.random.PRNGKey(0)
    k_params, k_x = jax.random.split(key)
    params = build_texture_layer_params(k_params, C, reduction)
    x = jax.random.normal(k_x, (B, C, H, W), jnp.float32)

    out = texture_layer_forward(x, params)
    out = jax.block_until_ready(out)

    assert out.shape == (B, C, H, W), out.shape
    assert bool(jnp.all(jnp.isfinite(out)))
    # y.expand_as(x): output must be spatially constant per (b, c)
    assert bool(jnp.all(out == out[:, :, :1, :1]))
    # numerical check against a pure-JAX reference of the torch module
    ref = jax.block_until_ready(texture_layer_reference(x, params))
    assert bool(jnp.allclose(out, ref, rtol=1e-4, atol=1e-4))
    print("KERNEL_OK")
</pallas_src>

<mosaic_0001>
module attributes {stable_mosaic.version = 11 : i64} {
  func.func @_pool_gemm_kernel(%arg0: i32, %arg1: i32, %arg2: memref<64x256xf32, #tpu.memory_space<vmem>>, %arg3: memref<256x128xf32, #tpu.memory_space<vmem>>, %arg4: memref<64x128xf32, #tpu.memory_space<vmem>>, %arg5: memref<64x128xf32, #tpu.memory_space<vmem>>) attributes {dimension_semantics = [#tpu.dimension_semantics<parallel>, #tpu.dimension_semantics<arbitrary>], iteration_bounds = array<i64: 1, 1>, scalar_prefetch = 0 : i64, scratch_operands = 1 : i64, tpu.core_type = #tpu.core_type<tc>, window_params = [{transform_indices = @transform_0, window_bounds = array<i64: 64, 256>}, {pipeline_mode = #tpu.pipeline_mode<synchronous>, transform_indices = @transform_1, window_bounds = array<i64: 256, 128>}, {transform_indices = @transform_2, window_bounds = array<i64: 64, 128>}]} {
    %c0_i32 = arith.constant 0 : i32
    %0 = arith.cmpi eq, %arg1, %c0_i32 : i32
    %1 = arith.extui %0 : i1 to i32
    %c0_i32_0 = arith.constant 0 : i32
    %2 = arith.cmpi ne, %1, %c0_i32_0 : i32
    scf.if %2 {
      %cst_9 = arith.constant 0.000000e+00 : f32
      %15 = vector.broadcast %cst_9 : f32 to vector<64x128xf32>
      %c0_10 = arith.constant 0 : index
      %c0_11 = arith.constant 0 : index
      %16 = vector.load %arg5[%c0_10, %c0_11] : memref<64x128xf32, #tpu.memory_space<vmem>>, vector<64x128xf32>
      tpu.vector_store %arg5[%c0_10, %c0_11], %15 {strides = array<i32>} : memref<64x128xf32, #tpu.memory_space<vmem>>, vector<64x128xf32>,
    } else {
    }
    %c0 = arith.constant 0 : index
    %c0_1 = arith.constant 0 : index
    %3 = vector.load %arg2[%c0, %c0_1] : memref<64x256xf32, #tpu.memory_space<vmem>>, vector<64x256xf32>
    %c256_i32 = arith.constant 256 : i32
    %4 = arith.muli %arg1, %c256_i32 : i32
    %5 = tpu.assume_multiple %4, 128 : i32
    %6 = arith.index_cast %5 : i32 to index
    %c0_2 = arith.constant 0 : index
    %7 = vector.load %arg3[%6, %c0_2] : memref<256x128xf32, #tpu.memory_space<vmem>>, vector<256x128xf32>
    %c0_3 = arith.constant 0 : index
    %c0_4 = arith.constant 0 : index
    %8 = vector.load %arg5[%c0_3, %c0_4] : memref<64x128xf32, #tpu.memory_space<vmem>>, vector<64x128xf32>
    %cst = arith.constant dense<0.000000e+00> : vector<64x128xf32>
    %9 = tpu.matmul %3, %7, %cst {dimension_numbers = #tpu.dot_dimension_numbers<[1], [0], [0], [1], [0, 0, 1, 1], [], []>} : vector<64x256xf32>, vector<256x128xf32>, vector<64x128xf32> -> vector<64x128xf32>
    %10 = arith.addf %8, %9 : vector<64x128xf32>
    %c0_5 = arith.constant 0 : index
    %c0_6 = arith.constant 0 : index
    %11 = vector.load %arg5[%c0_5, %c0_6] : memref<64x128xf32, #tpu.memory_space<vmem>>, vector<64x128xf32>
    tpu.vector_store %arg5[%c0_5, %c0_6], %10 {strides = array<i32>} : memref<64x128xf32, #tpu.memory_space<vmem>>, vector<64x128xf32>,
    %c0_i32_7 = arith.constant 0 : i32
    %12 = arith.cmpi eq, %arg1, %c0_i32_7 : i32
    %13 = arith.extui %12 : i1 to i32
    %c0_i32_8 = arith.constant 0 : i32
    %14 = arith.cmpi ne, %13, %c0_i32_8 : i32
    scf.if %14 {
      %c0_9 = arith.constant 0 : index
      %c0_10 = arith.constant 0 : index
      %15 = vector.load %arg5[%c0_9, %c0_10] : memref<64x128xf32, #tpu.memory_space<vmem>>, vector<64x128xf32>
      %c0_11 = arith.constant 0 : index
      %c0_12 = arith.constant 0 : index
      %16 = vector.load %arg4[%c0_11, %c0_12] : memref<64x128xf32, #tpu.memory_space<vmem>>, vector<64x128xf32>
      tpu.vector_store %arg4[%c0_11, %c0_12], %15 {strides = array<i32>} : memref<64x128xf32, #tpu.memory_space<vmem>>, vector<64x128xf32>,
    } else {
    }
    return
  }
  func.func @transform_0(%arg0: i32, %arg1: i32) -> (i32, i32) {
    %c0_i32 = arith.constant 0 : i32
    return %arg0, %arg1 : i32, i32
  }
  func.func @transform_1(%arg0: i32, %arg1: i32) -> (i32, i32) {
    %c0_i32 = arith.constant 0 : i32
    %c0_i32_0 = arith.constant 0 : i32
    %c0_i32_1 = arith.constant 0 : i32
    return %c0_i32, %c0_i32_0 : i32, i32
  }
  func.func @transform_2(%arg0: i32, %arg1: i32) -> (i32, i32) {
    %c0_i32 = arith.constant 0 : i32
    %c0_i32_0 = arith.constant 0 : i32
    return %arg0, %c0_i32 : i32, i32
  }
}

</mosaic_0001>

<bundles_post_ra>
// kernel: tpu_custom_call.1
= control target key start
LH: loop header
LB: loop body
LE: loop exit
PB: predicated region body
PF: predicated region fallthrough
CT: control target
= control target key end

     0   :  { %7 = vsyncpa [#allocation4], 0  ;;  %s405_s0 = inlined_call_operand.hbm [shape: f32[64,256], index: 0, kind: input, shape index: {}]   ;;  %s406_s1 = inlined_call_operand.hbm [shape: f32[256,128], index: 1, kind: input, shape index: {}]   ;;  %s407_s2 = inlined_call_operand.hbm [shape: f32[64,128], index: 2, kind: output, shape index: {}]  }
   0x1   :  { %8 = vsyncpa [#allocation7], 0 }
   0x2   :  { %9 = vsyncpa [#allocation5], 0  ;;  %s14_s11 = sshll.u32 %s405_s0, 4  ;;  %s368_s12 = smov [#allocation3]   ;;  %s15_s11 = int_to_ptr.hbm [resolvable:$true] %s14_s11 }
   0x3   :  { %s16_s13 = sshll.u32 %s368_s12, 4  ;;  %s27_s16 = sshll.u32 %s406_s1, 4  ;;  %s17_s13 = int_to_ptr.vmem [resolvable:$true] %s16_s13  ;;  %s28_s16 = int_to_ptr.hbm [resolvable:$true] %s27_s16 }
   0x4   :  { %s369_s17 = smov 256   ;;  %s370_s18 = smov 16  }
   0x5   :  { %22 = dma.hbm_to_vmem [thread:$0]  %s15_s11, 2048, %s17_s13, [#allocation4], %s369_s17, %s369_s17, %s370_s18  }
   0x6   :  { %s371_s19 = smov [#allocation6]   ;;  %s372_s21 = smov 128  }
   0x7   :  { %s29_s20 = sshll.u32 %s371_s19, 4  ;;  %s373_s22 = smov 8   ;;  %s30_s20 = int_to_ptr.vmem [resolvable:$true] %s29_s20 }
   0x8   :  { %35 = dma.hbm_to_vmem [thread:$0]  %s28_s16, 4096, %s30_s20, [#allocation7], %s372_s21, %s372_s21, %s373_s22  }
   0x9   :  { %362 = dma.done.wait [#allocation4], 2048  }
   0xa   :  { %363 = vsyncadd [#allocation4], 4294965248 }
   0xb   :  { %364 = dma.done.wait [#allocation7], 4096  }
   0xc   :  { %365 = vsyncadd [#allocation7], 4294963200  ;;  %v89_v0 = vld [vmem:[#allocation6 + $0x78] sm:$0xff]  ;;  %v88_v2 = vld [vmem:[#allocation6 + $0x70] sm:$0xff]  ;;  %s374_s0 = smov [#allocation8]   ;;  %s237_s25 = sshll.u32 %s407_s2, 4  ;;  %s238_s25 = int_to_ptr.hbm [resolvable:$true] %s237_s25 }
   0xd   :  { %v105_v1 = vld [vmem:[#allocation6 + $0xf8] sm:$0xff]  ;;  %251 = vmatpush.msra.mxu2 %v89_v0  ;;  %v104_v3 = vld [vmem:[#allocation6 + $0xf0] sm:$0xff]  ;;  %v87_v4 = vld [vmem:[#allocation6 + $0x68] sm:$0xff]  ;;  %114 = vmatpush.msra.mxu0 %v89_v0  ;;  %s235_s1 = sshll.u32 %s374_s0, 4  ;;  %s236_s1 = int_to_ptr.vmem [resolvable:$true] %s235_s1 }
   0xe   :  { %267 = vmatpush.msra.mxu3 %v105_v1  ;;  %v103_v5 = vld [vmem:[#allocation6 + $0xe8] sm:$0xff]  ;;  %155 = vmatpush.msra.mxu1 %v105_v1  ;;  %v86_v6 = vld [vmem:[#allocation6 + $0x60] sm:$0xff]  ;;  %v85_v8 = vld [vmem:[#allocation6 + $0x58] sm:$0xff] }
   0xf   :  { %252 = vmatpush.msra.mxu2 %v88_v2  ;;  %v102_v7 = vld [vmem:[#allocation6 + $0xe0] sm:$0xff]  ;;  %115 = vmatpush.msra.mxu0 %v88_v2  ;;  %v101_v9 = vld [vmem:[#allocation6 + $0xd8] sm:$0xff]  ;;  %v84_v10 = vld [vmem:[#allocation6 + $0x50] sm:$0xff] }
  0x10   :  { %268 = vmatpush.msra.mxu3 %v104_v3  ;;  %156 = vmatpush.msra.mxu1 %v104_v3  ;;  %v100_v11 = vld [vmem:[#allocation6 + $0xd0] sm:$0xff]  ;;  %v83_v12 = vld [vmem:[#allocation6 + $0x48] sm:$0xff]  ;;  %v82_v14 = vld [vmem:[#allocation6 + $0x40] sm:$0xff] }
  0x11   :  { %253 = vmatpush.msra.mxu2 %v87_v4  ;;  %116 = vmatpush.msra.mxu0 %v87_v4  ;;  %v99_v13 = vld [vmem:[#allocation6 + $0xc8] sm:$0xff]  ;;  %v98_v15 = vld [vmem:[#allocation6 + $0xc0] sm:$0xff]  ;;  %v81_v16 = vld [vmem:[#allocation6 + $0x38] sm:$0xff] }
  0x12   :  { %269 = vmatpush.msra.mxu3 %v103_v5  ;;  %157 = vmatpush.msra.mxu1 %v103_v5  ;;  %v97_v17 = vld [vmem:[#allocation6 + $0xb8] sm:$0xff]  ;;  %v80_v18 = vld [vmem:[#allocation6 + $0x30] sm:$0xff]  ;;  %v79_v20 = vld [vmem:[#allocation6 + $0x28] sm:$0xff] }
  0x13   :  { %254 = vmatpush.msra.mxu2 %v86_v6  ;;  %117 = vmatpush.msra.mxu0 %v86_v6  ;;  %v96_v19 = vld [vmem:[#allocation6 + $0xb0] sm:$0xff]  ;;  %v95_v21 = vld [vmem:[#allocation6 + $0xa8] sm:$0xff]  ;;  %v78_v22 = vld [vmem:[#allocation6 + $0x20] sm:$0xff] }
  0x14   :  { %270 = vmatpush.msra.mxu3 %v102_v7  ;;  %158 = vmatpush.msra.mxu1 %v102_v7  ;;  %v94_v23 = vld [vmem:[#allocation6 + $0xa0] sm:$0xff]  ;;  %v77_v24 = vld [vmem:[#allocation6 + $0x18] sm:$0xff]  ;;  %v76_v26 = vld [vmem:[#allocation6 + $0x10] sm:$0xff] }
  0x15   :  { %255 = vmatpush.msra.mxu2 %v85_v8  ;;  %118 = vmatpush.msra.mxu0 %v85_v8  ;;  %v93_v25 = vld [vmem:[#allocation6 + $0x98] sm:$0xff]  ;;  %v92_v27 = vld [vmem:[#allocation6 + $0x90] sm:$0xff]  ;;  %v75_v28 = vld [vmem:[#allocation6 + $0x8] sm:$0xff] }
  0x16   :  { %271 = vmatpush.msra.mxu3 %v101_v9  ;;  %159 = vmatpush.msra.mxu1 %v101_v9  ;;  %v91_v29 = vld [vmem:[#allocation6 + $0x88] sm:$0xff]  ;;  %v74_v30 = vld [vmem:[#allocation6] sm:$0xff]  ;;  %v66_v36 = vld [vmem:[#allocation3 + $0x50] sm:$0xff] }
  0x17   :  { %256 = vmatpush.msra.mxu2 %v84_v10  ;;  %119 = vmatpush.msra.mxu0 %v84_v10  ;;  %v90_v31 = vld [vmem:[#allocation6 + $0x80] sm:$0xff]  ;;  %v65_v33 = vld [vmem:[#allocation3 + $0x48] sm:$0xff]  ;;  %v67_v37 = vld [vmem:[#allocation3 + $0x58] sm:$0xff] }
  0x18   :  { %272 = vmatpush.msra.mxu3 %v100_v11  ;;  %160 = vmatpush.msra.mxu1 %v100_v11  ;;  %v64_v32 = vld [vmem:[#allocation3 + $0x40] sm:$0xff]  ;;  %v57_v35 = vld [vmem:[#allocation3 + $0x8] sm:$0xff]  ;;  %v58_v38 = vld [vmem:[#allocation3 + $0x10] sm:$0xff] }
  0x19   :  { %257 = vmatpush.msra.mxu2 %v83_v12  ;;  %120 = vmatpush.msra.mxu0 %v83_v12  ;;  %v56_v34 = vld [vmem:[#allocation3] sm:$0xff]  ;;  %v59_v39 = vld [vmem:[#allocation3 + $0x18] sm:$0xff]  ;;  %v69_v41 = vld [vmem:[#allocation3 + $0x68] sm:$0xff] }
  0x1a   :  { %273 = vmatpush.msra.mxu3 %v99_v13  ;;  %161 = vmatpush.msra.mxu1 %v99_v13  ;;  %v68_v40 = vld [vmem:[#allocation3 + $0x60] sm:$0xff]  ;;  %v61_v43 = vld [vmem:[#allocation3 + $0x28] sm:$0xff]  ;;  %v70_v44 = vld [vmem:[#allocation3 + $0x70] sm:$0xff] }
  0x1b   :  { %258 = vmatpush.msra.mxu2 %v82_v14  ;;  %121 = vmatpush.msra.mxu0 %v82_v14  ;;  %v60_v42 = vld [vmem:[#allocation3 + $0x20] sm:$0xff]  ;;  %v71_v45 = vld [vmem:[#allocation3 + $0x78] sm:$0xff]  ;;  %v62_v46 = vld [vmem:[#allocation3 + $0x30] sm:$0xff] }
  0x1c   :  { %274 = vmatpush.msra.mxu3 %v98_v15  ;;  %162 = vmatpush.msra.mxu1 %v98_v15  ;;  %v63_v47 = vld [vmem:[#allocation3 + $0x38] sm:$0xff] }
  0x1d   :  { %259 = vmatpush.msra.mxu2 %v81_v16  ;;  %122 = vmatpush.msra.mxu0 %v81_v16 }
  0x1e   :  { %275 = vmatpush.msra.mxu3 %v97_v17  ;;  %163 = vmatpush.msra.mxu1 %v97_v17 }
  0x1f   :  { %260 = vmatpush.msra.mxu2 %v80_v18  ;;  %123 = vmatpush.msra.mxu0 %v80_v18 }
  0x20   :  { %276 = vmatpush.msra.mxu3 %v96_v19  ;;  %164 = vmatpush.msra.mxu1 %v96_v19 }
  0x21   :  { %261 = vmatpush.msra.mxu2 %v79_v20  ;;  %124 = vmatpush.msra.mxu0 %v79_v20 }
  0x22   :  { %277 = vmatpush.msra.mxu3 %v95_v21  ;;  %165 = vmatpush.msra.mxu1 %v95_v21 }
  0x23   :  { %262 = vmatpush.msra.mxu2 %v78_v22  ;;  %125 = vmatpush.msra.mxu0 %v78_v22 }
  0x24   :  { %278 = vmatpush.msra.mxu3 %v94_v23  ;;  %166 = vmatpush.msra.mxu1 %v94_v23 }
  0x25   :  { %263 = vmatpush.msra.mxu2 %v77_v24  ;;  %126 = vmatpush.msra.mxu0 %v77_v24 }
  0x26   :  { %279 = vmatpush.msra.mxu3 %v93_v25  ;;  %167 = vmatpush.msra.mxu1 %v93_v25 }
  0x27   :  { %264 = vmatpush.msra.mxu2 %v76_v26  ;;  %127 = vmatpush.msra.mxu0 %v76_v26 }
  0x28   :  { %280 = vmatpush.msra.mxu3 %v92_v27  ;;  %168 = vmatpush.msra.mxu1 %v92_v27 }
  0x29   :  { %265 = vmatpush.msra.mxu2 %v75_v28  ;;  %128 = vmatpush.msra.mxu0 %v75_v28 }
  0x2a   :  { %281 = vmatpush.msra.mxu3 %v91_v29  ;;  %169 = vmatpush.msra.mxu1 %v91_v29 }
  0x2b   :  { %266 = vmatpush.msra.mxu2 %v74_v30  ;;  %129 = vmatpush.msra.mxu0 %v74_v30 }
  0x2c   :  { %282 = vmatpush.msra.mxu3 %v90_v31  ;;  %142 = vmatmul.f32.vlgmr.msra.gmra.mxu2 %v64_v32 }
  0x2d   :  { %183 = vmatmul.f32.vlgmr.msra.gmra.mxu3 %v65_v33  ;;  %170 = vmatpush.msra.mxu1 %v90_v31 }
  0x2e   :  { %130 = vmatmul.f32.vlgmr.msra.gmra.mxu0 %v56_v34  ;;  %171 = vmatmul.f32.vlgmr.msra.gmra.mxu1 %v57_v35 }
  0x34   :  { %145 = vmatmul.f32.gmra.mxu2 %v66_v36 }
  0x35   :  { %186 = vmatmul.f32.gmra.mxu3 %v67_v37 }
  0x36   :  { %133 = vmatmul.f32.gmra.mxu0 %v58_v38  ;;  %174 = vmatmul.f32.gmra.mxu1 %v59_v39 }
  0x3c   :  { %148 = vmatmul.f32.gmra.mxu2 %v68_v40 }
  0x3d   :  { %189 = vmatmul.f32.gmra.mxu3 %v69_v41 }
  0x3e   :  { %136 = vmatmul.f32.gmra.mxu0 %v60_v42  ;;  %177 = vmatmul.f32.gmra.mxu1 %v61_v43 }
  0x44   :  { %151 = vmatmul.f32.gmra.mxu2 %v70_v44 }
  0x45   :  { %192 = vmatmul.f32.gmra.mxu3 %v71_v45 }
  0x46   :  { %139 = vmatmul.f32.gmra.mxu0 %v62_v46  ;;  %180 = vmatmul.f32.gmra.mxu1 %v63_v47 }
  0xab   :  { %v131_v48 = vpop.f32.mrf.mxu0  ;;  %v172_v49 = vpop.f32.mrf.mxu1 }
  0xac   :  { %v173_v50 = vadd.f32 %v172_v49, %v131_v48 }
  0xae   :  { %223 = vst [vmem:[#allocation8] sm:$0xff] %v173_v50 }
  0xaf   :  { %v143_v51 = vpop.f32.mrf.mxu2 }
  0xb0   :  { %v184_v52 = vpop.f32.mrf.mxu3 }
  0xb1   :  { %v185_v53 = vadd.f32 %v184_v52, %v143_v51 }
  0xb3   :  { %227 = vst [vmem:[#allocation8 + $0x20] sm:$0xff] %v185_v53  ;;  %v134_v54 = vpop.f32.mrf.mxu0  ;;  %v175_v55 = vpop.f32.mrf.mxu1 }
  0xb4   :  { %v176_v56 = vadd.f32 %v175_v55, %v134_v54 }
  0xb6   :  { %224 = vst [vmem:[#allocation8 + $0x8] sm:$0xff] %v176_v56 }
  0xb7   :  { %v146_v57 = vpop.f32.mrf.mxu2 }
  0xb8   :  { %v187_v58 = vpop.f32.mrf.mxu3 }
  0xb9   :  { %v188_v59 = vadd.f32 %v187_v58, %v146_v57 }
  0xbb   :  { %228 = vst [vmem:[#allocation8 + $0x28] sm:$0xff] %v188_v59  ;;  %v137_v60 = vpop.f32.mrf.mxu0  ;;  %v178_v61 = vpop.f32.mrf.mxu1 }
  0xbc   :  { %v179_v62 = vadd.f32 %v178_v61, %v137_v60 }
  0xbe   :  { %225 = vst [vmem:[#allocation8 + $0x10] sm:$0xff] %v179_v62 }
  0xbf   :  { %v149_v63 = vpop.f32.mrf.mxu2 }
  0xc0   :  { %v190_v0 = vpop.f32.mrf.mxu3 }
  0xc1   :  { %v191_v1 = vadd.f32 %v190_v0, %v149_v63 }
  0xc3   :  { %229 = vst [vmem:[#allocation8 + $0x30] sm:$0xff] %v191_v1  ;;  %v140_v2 = vpop.f32.mrf.mxu0  ;;  %v181_v3 = vpop.f32.mrf.mxu1 }
  0xc4   :  { %v182_v4 = vadd.f32 %v181_v3, %v140_v2 }
  0xc6   :  { %226 = vst [vmem:[#allocation8 + $0x18] sm:$0xff] %v182_v4 }
  0xc7   :  { %v152_v5 = vpop.f32.mrf.mxu2 }
  0xc8   :  { %v193_v6 = vpop.f32.mrf.mxu3 }
  0xc9   :  { %v194_v7 = vadd.f32 %v193_v6, %v152_v5 }
  0xcb   :  { %230 = vst [vmem:[#allocation8 + $0x38] sm:$0xff] %v194_v7 }
  0xcc   :  { %243 = dma.vmem_to_hbm [thread:$0]  %s236_s1, 1024, %s238_s25, [#allocation5], %s372_s21, %s372_s21, %s373_s22  }
  0xcd   :  { %366 = dma.done.wait [#allocation5], 1024  }
  0xce   :  { %367 = vsyncadd [#allocation5], 4294966272 }
  0xcf   :  { %248 = vsyncpa [#allocation4], 1 }
  0xd0   :  { %249 = vsyncpa [#allocation7], 1 }
  0xd1   :  { %250 = vsyncpa [#allocation5], 1 }

</bundles_post_ra>
